<compile_context>
chip_gen: v7x
topology: tpu7x:2x2x1
jax: 0.10.0
libtpu: 0.0.40
codegen_flags: <defaults>
</compile_context>

<pallas_src>
import jax
import jax.numpy as jnp
from jax import lax
from jax.experimental import pallas as pl
from jax.experimental.pallas import tpu as pltpu


def continue_model_kernel(x_ref, w1t_ref, b1_ref, w2_ref, b2_ref, o_ref):
    # Hidden layer on the MXU with the batch mapped to the lane axis:
    # contract the feature dim of BOTH operands, (H, D) x (TB, D) -> (H, TB),
    # f32 accumulation.  Explicit dot_general so Mosaic never materializes a
    # transpose/relayout of the (batch_tile, D) x tile.
    h = lax.dot_general(
        w1t_ref[...], x_ref[...],
        dimension_numbers=(((1,), (1,)), ((), ())),
        preferred_element_type=jnp.float32)
    h = jnp.maximum(h + b1_ref[...].astype(jnp.float32), 0.0)  # (H,1) bias over lanes
    # Output head: VPU multiply + sublane (XLU) reduction instead of a
    # degenerate 1-column MXU matmul.  Result is already the lane-dense
    # (1, TB) output block -- no relayout at the store.
    logits = jnp.sum(h * w2_ref[...].astype(jnp.float32), axis=0, keepdims=True)
    o_ref[...] = (logits + b2_ref[0]).astype(o_ref.dtype)


def _round_up(x, m):
    return (x + m - 1) // m * m


def _plan_batch(batch, d_padded, target_block_bytes):
    """Pick (padded_batch, batch_tile) by bytes, not rows.

    - padded_batch is the batch rounded up to a multiple of 128 so the
      lane-dense output block stays 128-lane aligned.
    - batch_tile targets `target_block_bytes` of lane-padded x per buffer,
      is a multiple of 128, divides padded_batch, and yields >= 2 grid steps
      whenever padded_batch >= 256 (so v7x's 2 TensorCores both get work).
    """
    b_pad = _round_up(batch, 128)
    row_bytes = 4 * d_padded                       # f32 x row after lane padding
    tile = max(128, (target_block_bytes // row_bytes) // 128 * 128)
    if b_pad >= 256:
        tile = min(tile, (b_pad // 2) // 128 * 128)   # guarantee >= 2 grid steps
    tile = min(tile, b_pad)
    while b_pad % tile:                            # largest multiple-of-128 divisor
        tile -= 128
    return b_pad, tile


def continue_model_forward(x, w1t, b1, w2, b2, *, target_block_bytes=4 << 20):
    B, D = x.shape
    H, D2 = w1t.shape
    assert D2 == D
    assert b1.shape == (H, 1) and w2.shape == (H, 1) and b2.shape == (1,)

    d_pad = _round_up(D, 128)
    b_pad, batch_tile = _plan_batch(B, d_pad, target_block_bytes)
    grid = (b_pad // batch_tile,)

    # Ragged batch: pad rows to the lane-aligned size; sliced off below.
    x_in = x if b_pad == B else jnp.pad(x, ((0, b_pad - B), (0, 0)))

    # Explicit VMEM budget from the padded block sizes (x and out are
    # double-buffered by the pipeline, weights single-buffered), plus slack
    # for compiler scratch.  Clamp to [32 MiB, 48 MiB]: >= the v6e/v7x scoped
    # default, < v7x's 64 MiB physical VMEM (v5e/v6e have 128 MiB physical).
    elem = jnp.dtype(x_in.dtype).itemsize
    h_pad = _round_up(H, 8)
    x_block_bytes = batch_tile * d_pad * elem
    out_block_bytes = 8 * batch_tile * 4                      # (1, tile) -> 8 sublanes
    weight_bytes = (h_pad * d_pad + 2 * h_pad * 128) * 4
    needed = 2 * x_block_bytes + 2 * out_block_bytes + weight_bytes + (4 << 20)
    vmem_limit = min(max(needed, 32 << 20), 48 << 20)

    out = pl.pallas_call(
        continue_model_kernel,
        out_shape=jax.ShapeDtypeStruct((1, b_pad), jnp.float32),
        grid_spec=pltpu.PrefetchScalarGridSpec(
            num_scalar_prefetch=0,
            grid=grid,
            in_specs=[
                # x: tiled over batch, double-buffered by default.
                pl.BlockSpec((batch_tile, D), lambda i: (i, 0)),
                # Resident weights: constant index_map -> single buffer.
                pl.BlockSpec((H, D), lambda i: (0, 0),
                             pipeline_mode=pl.Buffered(1)),
                pl.BlockSpec((H, 1), lambda i: (0, 0),
                             pipeline_mode=pl.Buffered(1)),
                pl.BlockSpec((H, 1), lambda i: (0, 0),
                             pipeline_mode=pl.Buffered(1)),
                # b2: single scalar in SMEM.
                pl.BlockSpec(memory_space=pltpu.MemorySpace.SMEM),
            ],
            # Lane-dense output: batch along the lane axis; reshaped back to
            # (B, 1) by the wrapper (layout plumbing, not compute).
            out_specs=pl.BlockSpec((1, batch_tile), lambda i: (0, i)),
        ),
        compiler_params=pltpu.CompilerParams(
            # "parallel" shards the batch-tile loop across v7x's 2 TCs
            # (>= 2 steps guaranteed above); near-neutral on v5e/v6e.
            dimension_semantics=("parallel",),
            vmem_limit_bytes=vmem_limit,
        ),
    )(x_in, w1t, b1, w2, b2)

    logits = out.reshape(b_pad, 1)
    return logits if b_pad == B else logits[:B]


def init_params(key, input_dim, hidden_dim):
    # PyTorch nn.Linear default init: U(-1/sqrt(fan_in), 1/sqrt(fan_in)).
    k1, k2, k3, k4 = jax.random.split(key, 4)
    lim1 = 1.0 / float(input_dim) ** 0.5
    lim2 = 1.0 / float(hidden_dim) ** 0.5
    w1t = jax.random.uniform(k1, (hidden_dim, input_dim), jnp.float32, -lim1, lim1)
    b1 = jax.random.uniform(k2, (hidden_dim, 1), jnp.float32, -lim1, lim1)
    w2 = jax.random.uniform(k3, (hidden_dim, 1), jnp.float32, -lim2, lim2)
    b2 = jax.random.uniform(k4, (1,), jnp.float32, -lim2, lim2)
    return w1t, b1, w2, b2


if __name__ == "__main__":
    input_dim, hidden_dim = 32, 32

    key = jax.random.PRNGKey(0)
    k_x, k_x2, k_p = jax.random.split(key, 3)
    w1t, b1, w2, b2 = init_params(k_p, input_dim, hidden_dim)

    def ref_fwd(x):
        # Pure-JAX reference of the same forward pass (== the torch module).
        return jnp.maximum(x @ w1t.T + b1[:, 0][None, :], 0.0) @ w2 + b2[None, :]

    # Lane-aligned batch: two 128-row tiles -> a 2-step "parallel" grid
    # (exercises the multi-step pipeline / dual-TC sharding path).
    x = jax.random.normal(k_x, (256, input_dim), dtype=jnp.float32)
    logits = jax.block_until_ready(continue_model_forward(x, w1t, b1, w2, b2))
    assert logits.shape == (256, 1)
    assert jnp.allclose(logits, ref_fwd(x), atol=1e-4, rtol=1e-4)

    # Ragged batch: wrapper pads to 128 rows, slices the result back to 70.
    x2 = jax.random.normal(k_x2, (70, input_dim), dtype=jnp.float32)
    logits2 = jax.block_until_ready(continue_model_forward(x2, w1t, b1, w2, b2))
    assert logits2.shape == (70, 1)
    assert jnp.allclose(logits2, ref_fwd(x2), atol=1e-4, rtol=1e-4)

    print("KERNEL_OK")
</pallas_src>

<mosaic_0001>
module attributes {stable_mosaic.version = 11 : i64} {
  func.func @continue_model_kernel(%arg0: i32, %arg1: memref<128x32xf32, #tpu.memory_space<vmem>>, %arg2: memref<32x32xf32, #tpu.memory_space<vmem>>, %arg3: memref<32x1xf32, #tpu.memory_space<vmem>>, %arg4: memref<32x1xf32, #tpu.memory_space<vmem>>, %arg5: memref<1xf32, #tpu.memory_space<smem>>, %arg6: memref<1x128xf32, #tpu.memory_space<vmem>>) attributes {dimension_semantics = [#tpu.dimension_semantics<parallel>], iteration_bounds = array<i64: 2>, scalar_prefetch = 0 : i64, scratch_operands = 0 : i64, tpu.core_type = #tpu.core_type<tc>, window_params = [{transform_indices = @transform_0, window_bounds = array<i64: 128, 32>}, {pipeline_mode = #tpu.pipeline_mode<synchronous>, transform_indices = @transform_1, window_bounds = array<i64: 32, 32>}, {pipeline_mode = #tpu.pipeline_mode<synchronous>, transform_indices = @transform_2, window_bounds = array<i64: 32, 1>}, {pipeline_mode = #tpu.pipeline_mode<synchronous>, transform_indices = @transform_3, window_bounds = array<i64: 32, 1>}, {transform_indices = @transform_4, window_bounds = array<i64: 1>}, {transform_indices = @transform_5, window_bounds = array<i64: 1, 128>}]} {
    %c0 = arith.constant 0 : index
    %c0_0 = arith.constant 0 : index
    %0 = vector.load %arg2[%c0, %c0_0] : memref<32x32xf32, #tpu.memory_space<vmem>>, vector<32x32xf32>
    %c0_1 = arith.constant 0 : index
    %c0_2 = arith.constant 0 : index
    %1 = vector.load %arg1[%c0_1, %c0_2] : memref<128x32xf32, #tpu.memory_space<vmem>>, vector<128x32xf32>
    %cst = arith.constant dense<0.000000e+00> : vector<32x128xf32>
    %2 = tpu.matmul %0, %1, %cst {dimension_numbers = #tpu.dot_dimension_numbers<[1], [1], [0], [0], [0, 0, 1, 0], [], []>} : vector<32x32xf32>, vector<128x32xf32>, vector<32x128xf32> -> vector<32x128xf32>
    %c0_3 = arith.constant 0 : index
    %c0_4 = arith.constant 0 : index
    %3 = vector.load %arg3[%c0_3, %c0_4] : memref<32x1xf32, #tpu.memory_space<vmem>>, vector<32x1xf32>
    %4 = vector.broadcast %3 : vector<32x1xf32> to vector<32x128xf32>
    %5 = arith.addf %2, %4 : vector<32x128xf32>
    %cst_5 = arith.constant 0.000000e+00 : f32
    %6 = vector.broadcast %cst_5 : f32 to vector<32x128xf32>
    %7 = arith.maximumf %5, %6 : vector<32x128xf32>
    %c0_6 = arith.constant 0 : index
    %c0_7 = arith.constant 0 : index
    %8 = vector.load %arg4[%c0_6, %c0_7] : memref<32x1xf32, #tpu.memory_space<vmem>>, vector<32x1xf32>
    %9 = vector.broadcast %8 : vector<32x1xf32> to vector<32x128xf32>
    %10 = arith.mulf %7, %9 : vector<32x128xf32>
    %cst_8 = arith.constant dense<0.000000e+00> : vector<128xf32>
    %11 = vector.multi_reduction <add>, %10, %cst_8 [0] : vector<32x128xf32> to vector<128xf32>
    %12 = vector.shape_cast %11 : vector<128xf32> to vector<1x128xf32>
    %c0_9 = arith.constant 0 : index
    %13 = memref.load %arg5[%c0_9] : memref<1xf32, #tpu.memory_space<smem>>
    %14 = vector.broadcast %13 : f32 to vector<1x128xf32>
    %15 = arith.addf %12, %14 : vector<1x128xf32>
    %c0_10 = arith.constant 0 : index
    %c0_11 = arith.constant 0 : index
    %16 = vector.load %arg6[%c0_10, %c0_11] : memref<1x128xf32, #tpu.memory_space<vmem>>, vector<1x128xf32>
    tpu.vector_store %arg6[%c0_10, %c0_11], %15 {strides = array<i32>} : memref<1x128xf32, #tpu.memory_space<vmem>>, vector<1x128xf32>,
    return
  }
  func.func @transform_0(%arg0: i32) -> (i32, i32) {
    %c0_i32 = arith.constant 0 : i32
    %c0_i32_0 = arith.constant 0 : i32
    return %arg0, %c0_i32 : i32, i32
  }
  func.func @transform_1(%arg0: i32) -> (i32, i32) {
    %c0_i32 = arith.constant 0 : i32
    %c0_i32_0 = arith.constant 0 : i32
    %c0_i32_1 = arith.constant 0 : i32
    return %c0_i32, %c0_i32_0 : i32, i32
  }
  func.func @transform_2(%arg0: i32) -> (i32, i32) {
    %c0_i32 = arith.constant 0 : i32
    %c0_i32_0 = arith.constant 0 : i32
    %c0_i32_1 = arith.constant 0 : i32
    return %c0_i32, %c0_i32_0 : i32, i32
  }
  func.func @transform_3(%arg0: i32) -> (i32, i32) {
    %c0_i32 = arith.constant 0 : i32
    %c0_i32_0 = arith.constant 0 : i32
    %c0_i32_1 = arith.constant 0 : i32
    return %c0_i32, %c0_i32_0 : i32, i32
  }
  func.func @transform_4(%arg0: i32) -> i32 {
    %c0_i32 = arith.constant 0 : i32
    %c0_i32_0 = arith.constant 0 : i32
    return %c0_i32 : i32
  }
  func.func @transform_5(%arg0: i32) -> (i32, i32) {
    %c0_i32 = arith.constant 0 : i32
    %c0_i32_0 = arith.constant 0 : i32
    return %c0_i32, %arg0 : i32, i32
  }
}

</mosaic_0001>

<bundles_post_ra>
// kernel: tpu_custom_call.1
= control target key start
LH: loop header
LB: loop body
LE: loop exit
PB: predicated region body
PF: predicated region fallthrough
CT: control target
= control target key end

     0   :  { %s1047_s0 = inlined_call_operand.vmem [shape: f32[256,32], index: 0, kind: input, shape index: {}]   ;;  %s1048_s1 = inlined_call_operand.vmem [shape: f32[32,32], index: 1, kind: input, shape index: {}]   ;;  %s1049_s2 = inlined_call_operand.vmem [shape: f32[32,1], index: 2, kind: input, shape index: {}]   ;;  %s1050_s3 = inlined_call_operand.vmem [shape: f32[32,1], index: 3, kind: input, shape index: {}]   ;;  %s1051_s4 = inlined_call_operand.<no memory space> [shape: f32[1], index: 4, kind: input, shape index: {}]   ;;  %s1052_s5 = inlined_call_operand.hbm [shape: f32[1,256], index: 5, kind: output, shape index: {}]  }
   0x1   :  { %10 = sst [smem:[#allocation2]] %s1051_s4 }
   0x2   :  { %11 = vsyncpa [#allocation4], 0 }
   0x3   :  { %13 = vsyncpa [#allocation4 + $0x1], 0  ;;  %s820_s20 = smov 0   ;;  %s822_s21 = smov 0  }
   0x4   :  { %s824_s22 = smov 0   ;;  %s826_s23 = smov 0  }
   0x5 LB: > { %s527_s4 = sadd.s32 4294967295, %s783_s23   ;;  %s528_s24 = sadd.s32 4294967294, %s783_s23   ;;  %s783_s23 = sphi %s826_s23, %s1060_s23   ;;  %s779_s22 = sphi %s824_s22, %s1059_s22   ;;  %s775_s21 = sphi %s822_s21, %s1058_s21   ;;  %s771_s20 = sphi %s820_s20, %s1057_s20  }
   0x6   : > { %s843_s25 = sadd.s32 1, %s783_s23   ;;  %s136_s26 = sadd.s32 1, %s779_s22 }
   0x7   : > { %s133_s27 = ssub.s32 %s783_s23, %s843_s25  ;;  %p146_p0 = scmp.ne.s32.totalorder %s779_s22, %s775_s21 }
   0x8   : > { %p134_p1 = scmp.eq.s32.totalorder %s133_s27, 0  ;;  %p147_p2 = scmp.eq.s32.totalorder %s527_s4, 1 }
   0x9   : > { %p152_p3 = scmp.ne.s32.totalorder %s775_s21, %s771_s20  ;;  %p153_p4 = scmp.eq.s32.totalorder %s528_s24, 1 }
   0xa   : > { %s853_s28 = scalar_select %p134_p1, %s779_s22, %s136_s26  }
   0xb   : > { %p855_p5 = por %p147_p2, %p146_p0  ;;  %p859_p6 = por %p153_p4, %p152_p3 }
   0xc   : > { %p531_p7 = scmp.ge.s32.totalorder %s783_s23, 1  ;;  %p192_p8 = scmp.lt.s32.totalorder %s783_s23, 3 }
   0xe   : > { %p193_p9 = pnand %p531_p7, %p192_p8 }
   0xf   : > { %s865_s6 = sshll.u32 (!%p193_p9), %s527_s4, 4  ;;  %vm269_vm0 = vcmask (!%p193_p9), 261120   ;;  %v225_v0 = vld [vmem:[%s1048_s1] sm:$0xff] (!%p193_p9)  ;;  %v227_v1 = vld [vmem:[%s1048_s1 + $0x10] sm:$0xff] (!%p193_p9)  ;;  %v785_v3 = vmov (!%p193_p9), 0   ;;  %v246_v5 = vld [vmem:[%s1049_s2 + $0x8] sm:$0xff] (!%p193_p9) }
  0x10   : > { %196 = sbr.rel (%p193_p9) target bundleno = 347 (0x15b), region = 40  ;;  %p220_p10 = scmp.lt.s32.totalorder (!%p193_p9), %s865_s6, 31  ;;  %609 = vmatprep.mubr.msk.f32.mxu0 (!%p193_p9), %vm269_vm0, %v225_v0  ;;  %612 = vmatprep.mubr.msk.f32.mxu1 (!%p193_p9), %vm269_vm0, %v227_v1  ;;  %v245_v2 = vld [vmem:[%s1049_s2] sm:$0xff] (!%p193_p9)  ;;  %v247_v4 = vld [vmem:[%s1049_s2 + $0x10] sm:$0xff] (!%p193_p9)  ;;  %v248_v6 = vld [vmem:[%s1049_s2 + $0x18] sm:$0xff] (!%p193_p9) }
  0x11   : > { %719 = vset.pattern.permute.xlu0 (!%p193_p9), %v785_v3  ;;  %720 = vset.pattern.permute.xlu1 (!%p193_p9), %v785_v3  ;;  %vm896_vm1 = vmpackc.low (!%p193_p9), %vm269_vm0, %vm269_vm0  ;;  %v419_v14 = vld [vmem:[%s1050_s3] sm:$0xff] (!%p193_p9)  ;;  %v420_v15 = vld [vmem:[%s1050_s3 + $0x8] sm:$0xff] (!%p193_p9)  ;;  %s456_s19 = sld [smem:[#allocation2]] (!%p193_p9)  ;;  %s1005_s8 = scalar_lea.hbm (!%p193_p9), %s1052_s5, %s865_s6 }
  0x12   : > { %251 = vperm.xlu0 (!%p193_p9), %719, %v245_v2   ;;  %261 = vperm.xlu1 (!%p193_p9), %720, %v247_v4   ;;  %v421_v18 = vld [vmem:[%s1050_s3 + $0x10] sm:$0xff] (!%p193_p9)  ;;  %v422_v19 = vld [vmem:[%s1050_s3 + $0x18] sm:$0xff] (!%p193_p9)  ;;  %v226_v36 = vld [vmem:[%s1048_s1 + $0x8] sm:$0xff] (!%p193_p9)  ;;  %s786_s11 = smov (!%p193_p9), [#allocation3]  }
  0x13   : > { %v228_v37 = vld [vmem:[%s1048_s1 + $0x18] sm:$0xff] (!%p193_p9)  ;;  %s725_s12 = sshll.u32 (!%p193_p9), %s786_s11, 4  ;;  %s726_s12 = int_to_ptr.vmem [resolvable:$false] %s725_s12 }
  0x14   : > { %s727_s13 = scalar_lea.vmem (!%p193_p9), %s726_s12, 32 }
  0x16   : > { %256 = vperm.xlu0 (!%p193_p9), %719, %v246_v5   ;;  %266 = vperm.xlu1 (!%p193_p9), %720, %v248_v6  }
  0x17   : > { %s221_s15 = scalar_select %p220_p10, %s865_s6, 31  ;;  %v457_v6 = vstv %s456_s19 }
  0x19   : > { %s533_s4 = sshll.u32 %s221_s15, 3 }
  0x1a   : > { %s892_s27 = scalar_lea.vmem %s1047_s0, %s533_s4  ;;  %425 = vperm.xlu0 %719, %v419_v14   ;;  %430 = vperm.xlu1 %720, %v420_v15   ;;  %s217_s4 = sand.u32 1, %s775_s21  }
  0x1b   : > { %v229_v8 = vld [vmem:[%s892_s27] sm:$0xff]  ;;  %v230_v9 = vld [vmem:[%s892_s27 + $0x8] sm:$0xff]  ;;  %v231_v10 = vld [vmem:[%s892_s27 + $0x10] sm:$0xff]  ;;  %s218_s24 = scalar_lea.vmem [#allocation3], %s217_s4  ;;  %s461_s9 = scalar_lea.sflag [#allocation4], %s217_s4 }
  0x1c   : > { %v615_v11 = vpack.c.bf16 %v230_v9, %v229_v8  ;;  %v232_v12 = vld [vmem:[%s892_s27 + $0x18] sm:$0xff]  ;;  %v233_v16 = vld [vmem:[%s892_s27 + $0x20] sm:$0xff]  ;;  %v234_v17 = vld [vmem:[%s892_s27 + $0x28] sm:$0xff]  ;;  %s473_s26 = sshll.u32 %s218_s24, 4  ;;  %s1007_s26 = int_to_ptr.vmem [resolvable:$true] %s473_s26 }
  0x1d   : > { %v621_v13 = vpack.c.bf16 %v232_v12, %v231_v10  ;;  %v627_v20 = vpack.c.bf16 %v234_v17, %v233_v16  ;;  %v235_v21 = vld [vmem:[%s892_s27 + $0x30] sm:$0xff]  ;;  %v236_v22 = vld [vmem:[%s892_s27 + $0x38] sm:$0xff]  ;;  %v237_v24 = vld [vmem:[%s892_s27 + $0x40] sm:$0xff]  ;;  %s721_s10 = scalar_lea.vmem %s1007_s26, 16  ;;  %p728_p0 = scmp.lt.s32.totalorder %s1007_s26, %s726_s12 }
  0x1e   : > { %617 = vmatprep.subr.msk.bf16.mxu0 %vm896_vm1, %v615_v11  ;;  %663 = vmatprep.subr.msk.bf16.mxu1 %vm896_vm1, %v615_v11  ;;  %v633_v23 = vpack.c.bf16 %v236_v22, %v235_v21  ;;  %v238_v25 = vld [vmem:[%s892_s27 + $0x48] sm:$0xff]  ;;  %v239_v27 = vld [vmem:[%s892_s27 + $0x50] sm:$0xff]  ;;  %v240_v28 = vld [vmem:[%s892_s27 + $0x58] sm:$0xff]  ;;  %p722_p11 = scmp.ne.s32.totalorder %s1007_s26, %s721_s10  ;;  %p729_p1 = scmp.lt.s32.totalorder %s727_s13, %s721_s10 }
  0x1f   : > { %620 = vmatpush3.bf16.xpose.msk.msra.mxu0 %vm896_vm1, %v615_v11  ;;  %671 = vmatpush3.bf16.xpose.msk.msra.mxu1 %vm896_vm1, %v615_v11  ;;  %v639_v26 = vpack.c.bf16 %v238_v25, %v237_v24  ;;  %v645_v29 = vpack.c.bf16 %v240_v28, %v239_v27  ;;  %v241_v30 = vld [vmem:[%s892_s27 + $0x60] sm:$0xff]  ;;  %v242_v31 = vld [vmem:[%s892_s27 + $0x68] sm:$0xff]  ;;  %v243_v33 = vld [vmem:[%s892_s27 + $0x70] sm:$0xff] }
  0x20   : > { %623 = vmatprep.subr.msk.bf16.mxu0 %vm896_vm1, %v621_v13  ;;  %664 = vmatprep.subr.msk.bf16.mxu1 %vm896_vm1, %v621_v13  ;;  %v651_v32 = vpack.c.bf16 %v242_v31, %v241_v30  ;;  %v244_v34 = vld [vmem:[%s892_s27 + $0x78] sm:$0xff]  ;;  %p723_p12 = pnand %p722_p11, %p855_p5  ;;  %p730_p2 = por %p729_p1, %p728_p0 }
  0x21   : > { %435 = vperm.xlu0 %719, %v421_v18   ;;  %440 = vperm.xlu1 %720, %v422_v19   ;;  %v657_v35 = vpack.c.bf16 %v244_v34, %v243_v33 }
  0x22   : > { %p724_p13 = pneg %p723_p12 }
  0x24   : > { %p731_p3 = pnand %p730_p2, %p724_p13 }
  0x27   : > { %626 = vmatpush3.bf16.xpose.msk.msra.mxu0 %vm896_vm1, %v621_v13  ;;  %672 = vmatpush3.bf16.xpose.msk.msra.mxu1 %vm896_vm1, %v621_v13 }
  0x28   : > { %629 = vmatprep.subr.msk.bf16.mxu0 %vm896_vm1, %v627_v20  ;;  %665 = vmatprep.subr.msk.bf16.mxu1 %vm896_vm1, %v627_v20 }
  0x2f   : > { %632 = vmatpush3.bf16.xpose.msk.msra.mxu0 %vm896_vm1, %v627_v20  ;;  %673 = vmatpush3.bf16.xpose.msk.msra.mxu1 %vm896_vm1, %v627_v20 }
  0x30   : > { %635 = vmatprep.subr.msk.bf16.mxu0 %vm896_vm1, %v633_v23  ;;  %666 = vmatprep.subr.msk.bf16.mxu1 %vm896_vm1, %v633_v23 }
  0x37   : > { %638 = vmatpush3.bf16.xpose.msk.msra.mxu0 %vm896_vm1, %v633_v23  ;;  %674 = vmatpush3.bf16.xpose.msk.msra.mxu1 %vm896_vm1, %v633_v23 }
  0x38   : > { %641 = vmatprep.subr.msk.bf16.mxu0 %vm896_vm1, %v639_v26  ;;  %667 = vmatprep.subr.msk.bf16.mxu1 %vm896_vm1, %v639_v26 }
  0x3f   : > { %644 = vmatpush3.bf16.xpose.msk.msra.mxu0 %vm896_vm1, %v639_v26  ;;  %675 = vmatpush3.bf16.xpose.msk.msra.mxu1 %vm896_vm1, %v639_v26 }
  0x40   : > { %647 = vmatprep.subr.msk.bf16.mxu0 %vm896_vm1, %v645_v29  ;;  %668 = vmatprep.subr.msk.bf16.mxu1 %vm896_vm1, %v645_v29 }
  0x47   : > { %650 = vmatpush3.bf16.xpose.msk.msra.mxu0 %vm896_vm1, %v645_v29  ;;  %676 = vmatpush3.bf16.xpose.msk.msra.mxu1 %vm896_vm1, %v645_v29 }
  0x48   : > { %653 = vmatprep.subr.msk.bf16.mxu0 %vm896_vm1, %v651_v32  ;;  %669 = vmatprep.subr.msk.bf16.mxu1 %vm896_vm1, %v651_v32 }
  0x4f   : > { %656 = vmatpush3.bf16.xpose.msk.msra.mxu0 %vm896_vm1, %v651_v32  ;;  %677 = vmatpush3.bf16.xpose.msk.msra.mxu1 %vm896_vm1, %v651_v32 }
  0x50   : > { %659 = vmatprep.subr.msk.bf16.mxu0 %vm896_vm1, %v657_v35  ;;  %670 = vmatprep.subr.msk.bf16.mxu1 %vm896_vm1, %v657_v35 }
  0x57   : > { %662 = vmatpush3.bf16.xpose.msk.msra.mxu0 %vm896_vm1, %v657_v35  ;;  %678 = vmatpush3.bf16.xpose.msk.msra.mxu1 %vm896_vm1, %v657_v35 }
  0x5e   : > { %610 = vmatmul.mubr.msk.f32.vlgmr.msra.gmra.mrb[0].mxu0 %vm269_vm0, %v226_v36  ;;  %613 = vmatmul.mubr.msk.f32.vlgmr.msra.gmra.mrb[0].mxu1 %vm269_vm0, %v228_v37 }
  0x91   : > { %v252_v38 = vpop.permute.xlu0 %251  ;;  %v262_v39 = vpop.permute.xlu1 %261 }
  0x95   : > { %v257_v40 = vpop.permute.xlu0 %256  ;;  %v267_v41 = vpop.permute.xlu1 %266 }
  0x99   : > { %v426_v42 = vpop.permute.xlu0 %425  ;;  %v431_v51 = vpop.permute.xlu1 %430 }
  0xa0   : > { %v436_v58 = vpop.permute.xlu0 %435  ;;  %v441_v61 = vpop.permute.xlu1 %440 }
 0x131   : > { %v611_v43 = vpop.f32.mrb[0].mxu0  ;;  %v614_v44 = vpop.f32.mrb[0].mxu1 }
 0x132   : > { %v402_v45 = vadd.f32 %v611_v43, %v257_v40  ;;  %v396_v46 = vpop.f32.mrb[1].mxu0  ;;  %v406_v47 = vpop.f32.mrb[1].mxu1  ;;  %v412_v48 = vadd.f32 %v614_v44, %v267_v41 }
 0x133   : > { %v397_v49 = vadd.f32 %v396_v46, %v252_v38  ;;  %v407_v50 = vadd.f32 %v406_v47, %v262_v39 }
 0x134   : > { %v416_v52 = vmax.f32 %v402_v45, 0.0  ;;  %v418_v56 = vmax.f32 %v412_v48, 0.0 }
 0x135   : > { %v415_v53 = vmax.f32 %v397_v49, 0.0  ;;  %v417_v54 = vmax.f32 %v407_v50, 0.0 }
 0x136   : > { %v444_v55 = vmul.f32 %v431_v51, %v416_v52  ;;  %v446_v62 = vmul.f32 %v441_v61, %v418_v56 }
 0x137   : > { %v443_v57 = vmul.f32 %v426_v42, %v415_v53  ;;  %v445_v60 = vmul.f32 %v436_v58, %v417_v54 }
 0x139   : > { %v447_v59 = vadd.f32 %v444_v55, %v443_v57 }
 0x13b   : > { %v448_v63 = vadd.f32 %v447_v59, %v445_v60 }
 0x13d   : > { %v449_v0 = vadd.f32 %v448_v63, %v446_v62 }
 0x13f   : > { %v450_v1 = vrot.slane %v449_v0, 4 }
 0x141   : > { %v451_v2 = vadd.f32 %v450_v1, %v449_v0 }
 0x143   : > { %v452_v3 = vrot.slane %v451_v2, 2 }
 0x145   : > { %v453_v4 = vadd.f32 %v452_v3, %v451_v2 }
 0x147   : > { %v454_v5 = vrot.slane %v453_v4, 1 }
 0x149   : > { %v455_v7 = vadd.f32 %v454_v5, %v453_v4 }
 0x14b   : > { %v458_v8 = vadd.f32 %v457_v6, %v455_v7 }
 0x14d   : > { %459 = vst [vmem:[%s218_s24] sm:$0x1] %v458_v8 }
 0x14e   : > { %734 = shalt.err (!%p731_p3)
}
 0x14f   : > { %s735_s6 = scalar_lea.hbm %s1005_s8, 16  ;;  %s739_s16 = scalar_lea.hbm %s1052_s5, 32 }
 0x150   : > { %p736_p4 = scmp.ne.s32.totalorder %s1005_s8, %s735_s6  ;;  %p740_p9 = scmp.lt.u32.totalorder %s1005_s8, %s1052_s5 }
 0x151   : > { %p741_p10 = scmp.lt.u32.totalorder %s739_s16, %s735_s6  ;;  %p743_p12 = scmp.lt.u32.totalorder %s735_s6, %s1005_s8 }
 0x152   : > { %p737_p7 = pnand %p736_p4, %p855_p5 }
 0x153   : > { %p742_p11 = por %p741_p10, %p740_p9 }
 0x154   : > { %p738_p8 = pneg %p737_p7 }
 0x155   : > { %p744_p13 = por %p743_p12, %p742_p11 }
 0x157   : > { %p745_p0 = pnand %p744_p13, %p738_p8 }
 0x159   : > { %748 = shalt.err (!%p745_p0)
}
 0x15a   : > { %679 = dma.vmem_to_hbm [thread:$0]  (%p855_p5), %s1007_s26, 16, %s1005_s8, %s461_s9  }
 0x15b PF: > { %p685_p1 = scmp.ge.s32.totalorder %s783_s23, 2  ;;  %s485_s19 = sand.u32 1, %s771_s20  }
 0x15c   : > { %s486_s4 = scalar_lea.sflag [#allocation4], %s485_s19 }
 0x15d   : > { %p682_p2 = pnand %p685_p1, %p859_p6 }
 0x15f   : > { %766 = dma.done.wait (!%p682_p2), %s486_s4, 16  }
 0x160   : > { %768 = vsyncadd (!%p682_p2), %s486_s4, 4294967280  ;;  %p16_p3 = scmp.ge.s32.totalorder %s843_s25, 4   ;;  %s1057_s20 = smov %s775_s21 }
 0x161   : > { %s1058_s21 = smov %s779_s22  ;;  %s1059_s22 = smov %s853_s28 }
 0x162   : > { %s1060_s23 = smov %s843_s25  ;;  %18 = sbr.rel (!%p16_p3) target bundleno = 5 (0x5), region = 75 }
 0x169   :  { %490 = vsyncpa [#allocation4], 1 }
 0x16a   :  { %492 = vsyncpa [#allocation4 + $0x1], 1 }

</bundles_post_ra>
